<compile_context>
chip_gen: v7x
topology: tpu7x:2x2x1
jax: 0.10.0
libtpu: 0.0.40
codegen_flags: <defaults>
</compile_context>

<pallas_src>
import functools

import jax
import jax.numpy as jnp
from jax.experimental import pallas as pl
from jax.experimental.pallas import tpu as pltpu


LANE = 128      # TPU lane width (last dim)
SUBLANE = 8     # TPU sublane width (second-to-last dim)


def _round_up(n, m):
    return ((n + m - 1) // m) * m


# ---------------------------------------------------------------------------
# Hot-path kernel: 3 dense matmuls + relu + log_softmax (padded class lanes are
# already -1e30 via the pre-baked b3, so no in-kernel lane masking is needed).
# ---------------------------------------------------------------------------
def sparse_net_kernel(x_ref,
                      w1_ref, b1_ref,
                      w2_ref, b2_ref,
                      w3_ref, b3_ref,
                      out_ref):
    x = x_ref[...]

    # fc1 + relu (bf16 operands, f32 accumulate, f32 bias)
    h1 = jnp.dot(x.astype(w1_ref.dtype), w1_ref[...],
                 preferred_element_type=jnp.float32) + b1_ref[...]
    h1 = jnp.maximum(h1, 0.0)

    # fc2 + relu
    h2 = jnp.dot(h1.astype(w2_ref.dtype), w2_ref[...],
                 preferred_element_type=jnp.float32) + b2_ref[...]
    h2 = jnp.maximum(h2, 0.0)

    # fc3 (padded columns of w3 are zero; padded lanes of b3 are -1e30, so the
    # padded logits are -1e30 and drop out of the softmax normalizer).
    logits = jnp.dot(h2.astype(w3_ref.dtype), w3_ref[...],
                     preferred_element_type=jnp.float32) + b3_ref[...]

    # log_softmax over dim=1 (reductions -> XLU, exp -> EUP).
    m = jnp.max(logits, axis=-1, keepdims=True)
    shifted = logits - m
    lse = jnp.log(jnp.sum(jnp.exp(shifted), axis=-1, keepdims=True))
    out_ref[...] = (shifted - lse).astype(out_ref.dtype)


# ---------------------------------------------------------------------------
# One-time setup (outside the hot path): fold the sparse-VD mask into the
# weights, pad hidden/class dims to lane-dense multiples of 128, bake the
# padded-class -inf sentinel into b3, and cast weights to the compute dtype.
# Re-run only when weights / threshold change.
# ---------------------------------------------------------------------------
def make_effective_params(params, threshold, *, compute_dtype=jnp.bfloat16):
    def mask(w_t, ls_t):
        log_alpha = jnp.clip(2.0 * ls_t - 2.0 * jnp.log(1e-16 + jnp.abs(w_t)),
                             -10.0, 10.0)
        return jnp.where(log_alpha < threshold, w_t, 0.0)

    def pad2(a, rows, cols, fill=0.0):
        return jnp.pad(a, ((0, rows - a.shape[0]), (0, cols - a.shape[1])),
                       constant_values=fill)

    din, hid = params["w1_t"].shape
    n_classes = params["w3_t"].shape[1]
    # No 128-lane pad on the input dim: x keeps its natural feature width and
    # the (tb, din) / (din, hid_pad) blocks equal the full array dims. Only a
    # tiny sublane round-up (no-op for din=32).
    din_p = _round_up(din, SUBLANE)
    hid_p = _round_up(hid, LANE)
    cls_p = _round_up(n_classes, LANE)

    # Padded class lanes: zero w3 columns + (-1e30) bias -> logits = -1e30.
    b3 = pad2(params["b3"].astype(jnp.float32), 1, cls_p, fill=-1e30)

    return dict(
        w1=pad2(mask(params["w1_t"], params["ls1_t"]), din_p, hid_p).astype(compute_dtype),
        b1=pad2(params["b1"], 1, hid_p).astype(jnp.float32),
        w2=pad2(mask(params["w2_t"], params["ls2_t"]), hid_p, hid_p).astype(compute_dtype),
        b2=pad2(params["b2"], 1, hid_p).astype(jnp.float32),
        w3=pad2(mask(params["w3_t"], params["ls3_t"]), hid_p, cls_p).astype(compute_dtype),
        b3=b3,
    )


def _choose_batch_block(batch, cap=2048):
    """Batch tile: multiple of 8, capped, and split into >=2 grid steps when the
    batch is large enough so both v7x TensorCores get work."""
    bp = _round_up(batch, SUBLANE)
    tb = min(cap, _round_up(pl.cdiv(bp, 2), SUBLANE))
    return max(tb, SUBLANE)


# ---------------------------------------------------------------------------
# Wrapper: pad batch dim only, run the grid-tiled pallas_call, slice + upcast.
# ---------------------------------------------------------------------------
def sparse_net_forward(x, eff, *, n_classes, batch_block=None):
    batch, din = x.shape
    din_pad, hid_pad = eff["w1"].shape
    cls_pad = eff["w3"].shape[1]
    compute_dtype = eff["w1"].dtype

    tb = batch_block if batch_block is not None else _choose_batch_block(batch)
    batch_pad = _round_up(batch, tb)

    # Only the batch dim (and a possible tiny sublane round-up of din) is padded;
    # x is streamed in the compute dtype (bf16 by default).
    xp = jnp.pad(x.astype(compute_dtype),
                 ((0, batch_pad - batch), (0, din_pad - din)))

    out = pl.pallas_call(
        sparse_net_kernel,
        out_shape=jax.ShapeDtypeStruct((batch_pad, cls_pad), compute_dtype),
        grid=(batch_pad // tb,),
        in_specs=[
            pl.BlockSpec((tb, din_pad), lambda i: (i, 0)),        # x tile
            pl.BlockSpec((din_pad, hid_pad), lambda i: (0, 0)),   # w1 (resident)
            pl.BlockSpec((1, hid_pad), lambda i: (0, 0)),         # b1
            pl.BlockSpec((hid_pad, hid_pad), lambda i: (0, 0)),   # w2
            pl.BlockSpec((1, hid_pad), lambda i: (0, 0)),         # b2
            pl.BlockSpec((hid_pad, cls_pad), lambda i: (0, 0)),   # w3
            pl.BlockSpec((1, cls_pad), lambda i: (0, 0)),         # b3 (pad lanes = -1e30)
        ],
        out_specs=pl.BlockSpec((tb, cls_pad), lambda i: (i, 0)),  # lane-dense (128) output
        compiler_params=pltpu.CompilerParams(
            dimension_semantics=("parallel",)),                   # shards batch across TCs (v7x)
    )(xp, eff["w1"], eff["b1"], eff["w2"], eff["b2"], eff["w3"], eff["b3"])

    return out[:batch, :n_classes].astype(jnp.float32)


# ---------------------------------------------------------------------------
# Synthetic parameter init (matches LinearSVDO shapes: W [out,in], log_sigma
# [out,in], bias [1,out]); kernel-side storage uses the transposed [in,out].
# ---------------------------------------------------------------------------
def init_params(key, input_dim, hidden=100, n_classes=6):
    ks = jax.random.split(key, 6)

    def layer(kw, ks_, din, dout):
        w = jax.random.normal(kw, (dout, din), dtype=jnp.float32) * 0.1
        log_sigma = -3.0 + 0.5 * jax.random.normal(ks_, (dout, din), dtype=jnp.float32)
        b = jnp.zeros((1, dout), dtype=jnp.float32)
        return w.T, log_sigma.T, b

    w1_t, ls1_t, b1 = layer(ks[0], ks[1], input_dim, hidden)
    w2_t, ls2_t, b2 = layer(ks[2], ks[3], hidden, hidden)
    w3_t, ls3_t, b3 = layer(ks[4], ks[5], hidden, n_classes)

    return dict(w1_t=w1_t, ls1_t=ls1_t, b1=b1,
                w2_t=w2_t, ls2_t=ls2_t, b2=b2,
                w3_t=w3_t, ls3_t=ls3_t, b3=b3)


def reference_forward(x, params, threshold):
    """Pure-JAX f32 reference (unpadded, mask recomputed) for validation."""
    def lin(x_, w_t, ls_t, b):
        la = jnp.clip(2.0 * ls_t - 2.0 * jnp.log(1e-16 + jnp.abs(w_t)), -10.0, 10.0)
        w_eff = jnp.where(la < threshold, w_t, 0.0)
        return x_ @ w_eff + b

    h1 = jax.nn.relu(lin(x, params["w1_t"], params["ls1_t"], params["b1"]))
    h2 = jax.nn.relu(lin(h1, params["w2_t"], params["ls2_t"], params["b2"]))
    logits = lin(h2, params["w3_t"], params["ls3_t"], params["b3"])
    return jax.nn.log_softmax(logits, axis=1)


if __name__ == "__main__":
    key = jax.random.PRNGKey(0)
    k_x, k_p = jax.random.split(key)

    batch = 8
    input_dim = 32
    n_classes = 6
    threshold = 1.0

    x = jax.random.normal(k_x, (batch, input_dim), dtype=jnp.float32)
    params = init_params(k_p, input_dim, hidden=100, n_classes=n_classes)
    ref = reference_forward(x, params, threshold)

    fwd = jax.jit(functools.partial(sparse_net_forward, n_classes=n_classes))

    # 1) Tight correctness check with an f32 compute path.
    eff_f32 = make_effective_params(params, threshold, compute_dtype=jnp.float32)
    out_f32 = jax.block_until_ready(fwd(x, eff_f32))
    assert out_f32.shape == (batch, n_classes)
    assert jnp.allclose(out_f32, ref, atol=1e-5, rtol=1e-5), (
        float(jnp.max(jnp.abs(out_f32 - ref))))

    # 2) Default perf path: bf16 weights/activations/output, f32 accumulation.
    eff = make_effective_params(params, threshold)  # compute_dtype=bf16 default
    out = jax.block_until_ready(fwd(x, eff))
    assert out.shape == (batch, n_classes)
    assert jnp.allclose(out, ref, atol=2e-1, rtol=2e-2), (
        float(jnp.max(jnp.abs(out - ref))))

    print("KERNEL_OK")
</pallas_src>

<mosaic_0001>
module attributes {stable_mosaic.version = 11 : i64} {
  func.func @sparse_net_kernel(%arg0: i32, %arg1: memref<8x32xf32, #tpu.memory_space<vmem>>, %arg2: memref<32x128xf32, #tpu.memory_space<vmem>>, %arg3: memref<1x128xf32, #tpu.memory_space<vmem>>, %arg4: memref<128x128xf32, #tpu.memory_space<vmem>>, %arg5: memref<1x128xf32, #tpu.memory_space<vmem>>, %arg6: memref<128x128xf32, #tpu.memory_space<vmem>>, %arg7: memref<1x128xf32, #tpu.memory_space<vmem>>, %arg8: memref<8x128xf32, #tpu.memory_space<vmem>>) attributes {dimension_semantics = [#tpu.dimension_semantics<parallel>], iteration_bounds = array<i64: 1>, scalar_prefetch = 0 : i64, scratch_operands = 0 : i64, tpu.core_type = #tpu.core_type<tc>, window_params = [{transform_indices = @transform_0, window_bounds = array<i64: 8, 32>}, {pipeline_mode = #tpu.pipeline_mode<synchronous>, transform_indices = @transform_1, window_bounds = array<i64: 32, 128>}, {pipeline_mode = #tpu.pipeline_mode<synchronous>, transform_indices = @transform_2, window_bounds = array<i64: 1, 128>}, {pipeline_mode = #tpu.pipeline_mode<synchronous>, transform_indices = @transform_3, window_bounds = array<i64: 128, 128>}, {pipeline_mode = #tpu.pipeline_mode<synchronous>, transform_indices = @transform_4, window_bounds = array<i64: 1, 128>}, {pipeline_mode = #tpu.pipeline_mode<synchronous>, transform_indices = @transform_5, window_bounds = array<i64: 128, 128>}, {pipeline_mode = #tpu.pipeline_mode<synchronous>, transform_indices = @transform_6, window_bounds = array<i64: 1, 128>}, {transform_indices = @transform_7, window_bounds = array<i64: 8, 128>}]} {
    %c0 = arith.constant 0 : index
    %c0_0 = arith.constant 0 : index
    %0 = vector.load %arg1[%c0, %c0_0] : memref<8x32xf32, #tpu.memory_space<vmem>>, vector<8x32xf32>
    %c0_1 = arith.constant 0 : index
    %c0_2 = arith.constant 0 : index
    %1 = vector.load %arg2[%c0_1, %c0_2] : memref<32x128xf32, #tpu.memory_space<vmem>>, vector<32x128xf32>
    %cst = arith.constant dense<0.000000e+00> : vector<8x128xf32>
    %2 = tpu.matmul %0, %1, %cst {dimension_numbers = #tpu.dot_dimension_numbers<[1], [0], [0], [1], [0, 0, 1, 1], [], []>} : vector<8x32xf32>, vector<32x128xf32>, vector<8x128xf32> -> vector<8x128xf32>
    %c0_3 = arith.constant 0 : index
    %c0_4 = arith.constant 0 : index
    %3 = vector.load %arg3[%c0_3, %c0_4] : memref<1x128xf32, #tpu.memory_space<vmem>>, vector<1x128xf32>
    %4 = vector.broadcast %3 : vector<1x128xf32> to vector<8x128xf32>
    %5 = arith.addf %2, %4 : vector<8x128xf32>
    %cst_5 = arith.constant 0.000000e+00 : f32
    %6 = vector.broadcast %cst_5 : f32 to vector<8x128xf32>
    %7 = arith.maximumf %5, %6 : vector<8x128xf32>
    %c0_6 = arith.constant 0 : index
    %c0_7 = arith.constant 0 : index
    %8 = vector.load %arg4[%c0_6, %c0_7] : memref<128x128xf32, #tpu.memory_space<vmem>>, vector<128x128xf32>
    %cst_8 = arith.constant dense<0.000000e+00> : vector<8x128xf32>
    %9 = tpu.matmul %7, %8, %cst_8 {dimension_numbers = #tpu.dot_dimension_numbers<[1], [0], [0], [1], [0, 0, 1, 1], [], []>} : vector<8x128xf32>, vector<128x128xf32>, vector<8x128xf32> -> vector<8x128xf32>
    %c0_9 = arith.constant 0 : index
    %c0_10 = arith.constant 0 : index
    %10 = vector.load %arg5[%c0_9, %c0_10] : memref<1x128xf32, #tpu.memory_space<vmem>>, vector<1x128xf32>
    %11 = vector.broadcast %10 : vector<1x128xf32> to vector<8x128xf32>
    %12 = arith.addf %9, %11 : vector<8x128xf32>
    %cst_11 = arith.constant 0.000000e+00 : f32
    %13 = vector.broadcast %cst_11 : f32 to vector<8x128xf32>
    %14 = arith.maximumf %12, %13 : vector<8x128xf32>
    %c0_12 = arith.constant 0 : index
    %c0_13 = arith.constant 0 : index
    %15 = vector.load %arg6[%c0_12, %c0_13] : memref<128x128xf32, #tpu.memory_space<vmem>>, vector<128x128xf32>
    %cst_14 = arith.constant dense<0.000000e+00> : vector<8x128xf32>
    %16 = tpu.matmul %14, %15, %cst_14 {dimension_numbers = #tpu.dot_dimension_numbers<[1], [0], [0], [1], [0, 0, 1, 1], [], []>} : vector<8x128xf32>, vector<128x128xf32>, vector<8x128xf32> -> vector<8x128xf32>
    %c0_15 = arith.constant 0 : index
    %c0_16 = arith.constant 0 : index
    %17 = vector.load %arg7[%c0_15, %c0_16] : memref<1x128xf32, #tpu.memory_space<vmem>>, vector<1x128xf32>
    %18 = vector.broadcast %17 : vector<1x128xf32> to vector<8x128xf32>
    %19 = arith.addf %16, %18 : vector<8x128xf32>
    %cst_17 = arith.constant dense<0xFF800000> : vector<8xf32>
    %20 = vector.multi_reduction <maximumf>, %19, %cst_17 [1] : vector<8x128xf32> to vector<8xf32>
    %21 = vector.shape_cast %20 : vector<8xf32> to vector<8x1xf32>
    %22 = vector.broadcast %21 : vector<8x1xf32> to vector<8x128xf32>
    %23 = arith.subf %19, %22 : vector<8x128xf32>
    %24 = math.exp %23 : vector<8x128xf32>
    %cst_18 = arith.constant dense<0.000000e+00> : vector<8xf32>
    %25 = vector.multi_reduction <add>, %24, %cst_18 [1] : vector<8x128xf32> to vector<8xf32>
    %26 = vector.shape_cast %25 : vector<8xf32> to vector<8x1xf32>
    %27 = math.log %26 : vector<8x1xf32>
    %28 = vector.broadcast %27 : vector<8x1xf32> to vector<8x128xf32>
    %29 = arith.subf %23, %28 : vector<8x128xf32>
    %c0_19 = arith.constant 0 : index
    %c0_20 = arith.constant 0 : index
    %30 = vector.load %arg8[%c0_19, %c0_20] : memref<8x128xf32, #tpu.memory_space<vmem>>, vector<8x128xf32>
    tpu.vector_store %arg8[%c0_19, %c0_20], %29 {strides = array<i32>} : memref<8x128xf32, #tpu.memory_space<vmem>>, vector<8x128xf32>,
    return
  }
  func.func @transform_0(%arg0: i32) -> (i32, i32) {
    %c0_i32 = arith.constant 0 : i32
    %c0_i32_0 = arith.constant 0 : i32
    return %arg0, %c0_i32 : i32, i32
  }
  func.func @transform_1(%arg0: i32) -> (i32, i32) {
    %c0_i32 = arith.constant 0 : i32
    %c0_i32_0 = arith.constant 0 : i32
    %c0_i32_1 = arith.constant 0 : i32
    return %c0_i32, %c0_i32_0 : i32, i32
  }
  func.func @transform_2(%arg0: i32) -> (i32, i32) {
    %c0_i32 = arith.constant 0 : i32
    %c0_i32_0 = arith.constant 0 : i32
    %c0_i32_1 = arith.constant 0 : i32
    return %c0_i32, %c0_i32_0 : i32, i32
  }
  func.func @transform_3(%arg0: i32) -> (i32, i32) {
    %c0_i32 = arith.constant 0 : i32
    %c0_i32_0 = arith.constant 0 : i32
    %c0_i32_1 = arith.constant 0 : i32
    return %c0_i32, %c0_i32_0 : i32, i32
  }
  func.func @transform_4(%arg0: i32) -> (i32, i32) {
    %c0_i32 = arith.constant 0 : i32
    %c0_i32_0 = arith.constant 0 : i32
    %c0_i32_1 = arith.constant 0 : i32
    return %c0_i32, %c0_i32_0 : i32, i32
  }
  func.func @transform_5(%arg0: i32) -> (i32, i32) {
    %c0_i32 = arith.constant 0 : i32
    %c0_i32_0 = arith.constant 0 : i32
    %c0_i32_1 = arith.constant 0 : i32
    return %c0_i32, %c0_i32_0 : i32, i32
  }
  func.func @transform_6(%arg0: i32) -> (i32, i32) {
    %c0_i32 = arith.constant 0 : i32
    %c0_i32_0 = arith.constant 0 : i32
    %c0_i32_1 = arith.constant 0 : i32
    return %c0_i32, %c0_i32_0 : i32, i32
  }
  func.func @transform_7(%arg0: i32) -> (i32, i32) {
    %c0_i32 = arith.constant 0 : i32
    %c0_i32_0 = arith.constant 0 : i32
    return %arg0, %c0_i32 : i32, i32
  }
}

</mosaic_0001>

<bundles_post_ra>
// kernel: sparse_net_forward.1
= control target key start
LH: loop header
LB: loop body
LE: loop exit
PB: predicated region body
PF: predicated region fallthrough
CT: control target
= control target key end

     0   :  { %12 = vsyncpa [#allocation3], 0  ;;  %s841_s0 = inlined_call_operand.hbm [shape: f32[8,32], index: 0, kind: input, shape index: {}]   ;;  %s842_s1 = inlined_call_operand.hbm [shape: f32[32,128], index: 1, kind: input, shape index: {}]   ;;  %s843_s2 = inlined_call_operand.vmem [shape: f32[1,128], index: 2, kind: input, shape index: {}]   ;;  %s844_s3 = inlined_call_operand.hbm [shape: f32[128,128], index: 3, kind: input, shape index: {}]   ;;  %s845_s4 = inlined_call_operand.vmem [shape: f32[1,128], index: 4, kind: input, shape index: {}]   ;;  %s846_s5 = inlined_call_operand.hbm [shape: f32[128,128], index: 5, kind: input, shape index: {}]   ;;  %s847_s6 = inlined_call_operand.vmem [shape: f32[1,128], index: 6, kind: input, shape index: {}]   ;;  %s848_s7 = inlined_call_operand.hbm [shape: f32[8,128], index: 7, kind: output, shape index: {}]  }
   0x1   :  { %13 = vsyncpa [#allocation6], 0 }
   0x2   :  { %14 = vsyncpa [#allocation9], 0 }
   0x3   :  { %15 = vsyncpa [#allocation4], 0  ;;  %s692_s24 = smov [#allocation5]   ;;  %s574_s28 = scalar_lea.hbm %s842_s1, 512 }
   0x4   :  { %s31_s25 = sshll.u32 %s692_s24, 4  ;;  %p575_p0 = scmp.ne.s32.totalorder %s842_s1, %s574_s28  ;;  %s32_s25 = int_to_ptr.vmem [resolvable:$true] %s31_s25 }
   0x5   :  { %p578_p1 = scmp.lt.u32.totalorder %s574_s28, %s842_s1 }
   0x7   :  { %p580_p2 = pnand %p578_p1, %p575_p0 }
   0x9   :  { %583 = shalt.err (!%p580_p2)
}
   0xa   :  { %s584_s10 = scalar_lea.vmem %s32_s25, 512  ;;  %p589_p4 = scmp.lt.s32.totalorder %s32_s25, %s32_s25 }
   0xb   :  { %p585_p3 = scmp.ne.s32.totalorder %s32_s25, %s584_s10  ;;  %p590_p5 = scmp.lt.s32.totalorder %s584_s10, %s584_s10 }
   0xd   :  { %p591_p6 = por %p590_p5, %p589_p4 }
   0xf   :  { %p592_p7 = pnand %p591_p6, %p585_p3 }
  0x11   :  { %595 = shalt.err (!%p592_p7)
}
  0x12   :  { %s693_s11 = smov 128   ;;  %s694_s12 = smov 8  }
  0x13   :  { %37 = dma.hbm_to_vmem [thread:$0]  %s842_s1, 512, %s32_s25, [#allocation6], %s693_s11, %s693_s11, %s694_s12  }
  0x14   :  { %s695_s15 = smov [#allocation2]   ;;  %s696_s17 = smov [#allocation7]  }
  0x15   :  { %s22_s16 = sshll.u32 %s695_s15, 4  ;;  %s45_s18 = sshll.u32 %s696_s17, 4  ;;  %s23_s16 = int_to_ptr.vmem [resolvable:$true] %s22_s16  ;;  %s46_s18 = int_to_ptr.vmem [resolvable:$true] %s45_s18 }
  0x16   :  { %s596_s21 = scalar_lea.hbm %s841_s0, 128 }
  0x17   :  { %p597_p8 = scmp.ne.s32.totalorder %s841_s0, %s596_s21  ;;  %p600_p9 = scmp.lt.u32.totalorder %s596_s21, %s841_s0 }
  0x19   :  { %p602_p10 = pnand %p600_p9, %p597_p8 }
  0x1b   :  { %605 = shalt.err (!%p602_p10)
}
  0x1c   :  { %s606_s1 = scalar_lea.vmem %s23_s16, 128  ;;  %p611_p12 = scmp.lt.s32.totalorder %s23_s16, %s23_s16 }
  0x1d   :  { %p607_p11 = scmp.ne.s32.totalorder %s23_s16, %s606_s1  ;;  %p612_p13 = scmp.lt.s32.totalorder %s606_s1, %s606_s1 }
  0x1f   :  { %p613_p0 = por %p612_p13, %p611_p12 }
  0x21   :  { %p614_p1 = pnand %p613_p0, %p607_p11 }
  0x23   :  { %617 = shalt.err (!%p614_p1)
}
  0x24   :  { %25 = dma.hbm_to_vmem [thread:$0]  %s841_s0, 128, %s23_s16, [#allocation3]  }
  0x25   :  { %s618_s30 = scalar_lea.hbm %s844_s3, 2048 }
  0x26   :  { %p619_p2 = scmp.ne.s32.totalorder %s844_s3, %s618_s30  ;;  %p622_p3 = scmp.lt.u32.totalorder %s618_s30, %s844_s3 }
  0x28   :  { %p624_p4 = pnand %p622_p3, %p619_p2 }
  0x2a   :  { %627 = shalt.err (!%p624_p4)
}
  0x2b   :  { %s628_s14 = scalar_lea.vmem %s46_s18, 2048  ;;  %p633_p6 = scmp.lt.s32.totalorder %s46_s18, %s46_s18 }
  0x2c   :  { %p629_p5 = scmp.ne.s32.totalorder %s46_s18, %s628_s14  ;;  %p634_p7 = scmp.lt.s32.totalorder %s628_s14, %s628_s14 }
  0x2e   :  { %p635_p8 = por %p634_p7, %p633_p6 }
  0x30   :  { %p636_p9 = pnand %p635_p8, %p629_p5 }
  0x32   :  { %639 = shalt.err (!%p636_p9)
}
  0x33   :  { %51 = dma.hbm_to_vmem [thread:$0]  %s844_s3, 2048, %s46_s18, [#allocation6], %s693_s11, %s693_s11, %s694_s12  }
  0x34   :  { %s697_s16 = smov [#allocation8]   ;;  %s640_s21 = scalar_lea.hbm %s846_s5, 2048 }
  0x35   :  { %s59_s17 = sshll.u32 %s697_s16, 4  ;;  %p641_p10 = scmp.ne.s32.totalorder %s846_s5, %s640_s21  ;;  %s60_s17 = int_to_ptr.vmem [resolvable:$true] %s59_s17 }
  0x36   :  { %p644_p11 = scmp.lt.u32.totalorder %s640_s21, %s846_s5 }
  0x38   :  { %p646_p12 = pnand %p644_p11, %p641_p10 }
  0x3a   :  { %649 = shalt.err (!%p646_p12)
}
  0x3b   :  { %s650_s1 = scalar_lea.vmem %s60_s17, 2048  ;;  %p655_p0 = scmp.lt.s32.totalorder %s60_s17, %s60_s17 }
  0x3c   :  { %p651_p13 = scmp.ne.s32.totalorder %s60_s17, %s650_s1  ;;  %p656_p1 = scmp.lt.s32.totalorder %s650_s1, %s650_s1 }
  0x3e   :  { %p657_p2 = por %p656_p1, %p655_p0 }
  0x40   :  { %p658_p3 = pnand %p657_p2, %p651_p13 }
  0x42   :  { %661 = shalt.err (!%p658_p3)
}
  0x43   :  { %65 = dma.hbm_to_vmem [thread:$0]  %s846_s5, 2048, %s60_s17, [#allocation9], %s693_s11, %s693_s11, %s694_s12  }
  0x44   :  { %684 = dma.done.wait [#allocation3], 128  }
  0x45   :  { %685 = vsyncadd [#allocation3], 4294967168 }
  0x46   :  { %686 = dma.done.wait [#allocation6], 2560  }
  0x47   :  { %687 = vsyncadd [#allocation6], 4294964736 }
  0x48   :  { %688 = dma.done.wait [#allocation9], 2048  }
  0x49   :  { %689 = vsyncadd [#allocation9], 4294965248  ;;  %v698_v0 = vmov 0.0|0.0   ;;  %vm699_vm0 = vmmov 0   ;;  %v700_v1 = vmov 0.0   ;;  %v81_v2 = vld [vmem:[#allocation5] sm:$0xff] }
  0x4a   :  { %506 = vmatprep.subr.bf16.mxu0 %v698_v0  ;;  %433 = vmatprep.mubr.msk.f32.mxu0 %vm699_vm0, %v700_v1  ;;  %v82_v3 = vld [vmem:[#allocation5 + $0x8] sm:$0xff]  ;;  %v83_v4 = vld [vmem:[#allocation5 + $0x10] sm:$0xff]  ;;  %v84_v6 = vld [vmem:[#allocation5 + $0x18] sm:$0xff]  ;;  %vm92_vm1 = vcmask 261120  }
  0x4b   :  { %512 = vmatprep.subr.bf16.mxu1 %v698_v0  ;;  %468 = vmatprep.mubr.msk.f32.mxu1 %vm699_vm0, %v700_v1  ;;  %v507_v5 = vpack.c.bf16 %v82_v3, %v81_v2  ;;  %v167_v7 = vld [vmem:[#allocation7] sm:$0xff]  ;;  %v168_v8 = vld [vmem:[#allocation7 + $0x8] sm:$0xff]  ;;  %v169_v9 = vld [vmem:[#allocation7 + $0x10] sm:$0xff]  ;;  %v510_v11 = vpack.c.bf16 %v84_v6, %v83_v4 }
  0x4c   :  { %v170_v10 = vld [vmem:[#allocation7 + $0x18] sm:$0xff]  ;;  %v513_v12 = vpack.c.bf16 %v168_v8, %v167_v7  ;;  %v171_v14 = vld [vmem:[#allocation7 + $0x20] sm:$0xff]  ;;  %v172_v15 = vld [vmem:[#allocation7 + $0x28] sm:$0xff] }
  0x4d   :  { %508 = vmatpush3.bf16.msra.mxu0 %v507_v5  ;;  %v516_v13 = vpack.c.bf16 %v170_v10, %v169_v9  ;;  %v80_v16 = vld [vmem:[#allocation2] sm:$0xff]  ;;  %v519_v17 = vpack.c.bf16 %v172_v15, %v171_v14  ;;  %v173_v18 = vld [vmem:[#allocation7 + $0x30] sm:$0xff]  ;;  %v175_v21 = vld [vmem:[#allocation7 + $0x40] sm:$0xff] }
  0x4e   :  { %509 = vmatprep.subr.bf16.mxu0 %v698_v0  ;;  %514 = vmatpush3.bf16.msra.mxu1 %v513_v12  ;;  %v174_v19 = vld [vmem:[#allocation7 + $0x38] sm:$0xff]  ;;  %v176_v22 = vld [vmem:[#allocation7 + $0x48] sm:$0xff]  ;;  %v177_v24 = vld [vmem:[#allocation7 + $0x50] sm:$0xff] }
  0x4f   :  { %515 = vmatprep.subr.bf16.mxu1 %v698_v0  ;;  %v522_v20 = vpack.c.bf16 %v174_v19, %v173_v18  ;;  %v525_v23 = vpack.c.bf16 %v176_v22, %v175_v21  ;;  %v178_v25 = vld [vmem:[#allocation7 + $0x58] sm:$0xff]  ;;  %v179_v27 = vld [vmem:[#allocation7 + $0x60] sm:$0xff]  ;;  %v180_v28 = vld [vmem:[#allocation7 + $0x68] sm:$0xff] }
  0x50   :  { %v528_v26 = vpack.c.bf16 %v178_v25, %v177_v24  ;;  %v531_v29 = vpack.c.bf16 %v180_v28, %v179_v27  ;;  %v181_v30 = vld [vmem:[#allocation7 + $0x70] sm:$0xff]  ;;  %v182_v31 = vld [vmem:[#allocation7 + $0x78] sm:$0xff]  ;;  %v261_v33 = vld [vmem:[#allocation8] sm:$0xff] }
  0x51   :  { %511 = vmatpush3.bf16.msra.mxu0 %v510_v11  ;;  %v534_v32 = vpack.c.bf16 %v182_v31, %v181_v30  ;;  %v262_v34 = vld [vmem:[#allocation8 + $0x8] sm:$0xff]  ;;  %v263_v35 = vld [vmem:[#allocation8 + $0x10] sm:$0xff]  ;;  %v264_v37 = vld [vmem:[#allocation8 + $0x18] sm:$0xff] }
  0x52   :  { %536 = vmatprep.subr.bf16.mxu0 %v698_v0  ;;  %517 = vmatpush3.bf16.msra.mxu1 %v516_v13  ;;  %v537_v36 = vpack.c.bf16 %v262_v34, %v261_v33  ;;  %v540_v38 = vpack.c.bf16 %v264_v37, %v263_v35  ;;  %v265_v39 = vld [vmem:[#allocation8 + $0x20] sm:$0xff]  ;;  %v266_v40 = vld [vmem:[#allocation8 + $0x28] sm:$0xff]  ;;  %v267_v42 = vld [vmem:[#allocation8 + $0x30] sm:$0xff] }
  0x53   :  { %518 = vmatprep.subr.bf16.mxu1 %v698_v0  ;;  %v543_v41 = vpack.c.bf16 %v266_v40, %v265_v39  ;;  %v268_v43 = vld [vmem:[#allocation8 + $0x38] sm:$0xff]  ;;  %v269_v45 = vld [vmem:[#allocation8 + $0x40] sm:$0xff]  ;;  %v270_v46 = vld [vmem:[#allocation8 + $0x48] sm:$0xff] }
  0x54   :  { %434 = vmatmul.mubr.msk.f32.vlgmr.msra.gmra.mrb[0].mxu0 %vm92_vm1, %v80_v16  ;;  %v546_v44 = vpack.c.bf16 %v268_v43, %v267_v42  ;;  %v549_v47 = vpack.c.bf16 %v270_v46, %v269_v45  ;;  %v271_v48 = vld [vmem:[#allocation8 + $0x50] sm:$0xff]  ;;  %v272_v49 = vld [vmem:[#allocation8 + $0x58] sm:$0xff]  ;;  %v273_v51 = vld [vmem:[#allocation8 + $0x60] sm:$0xff] }
  0x55   :  { %503 = vmatprep.mubr.msk.f32.mxu0 %vm699_vm0, %v700_v1  ;;  %538 = vmatpush3.bf16.msra.mxu0 %v537_v36  ;;  %v552_v50 = vpack.c.bf16 %v272_v49, %v271_v48  ;;  %v274_v52 = vld [vmem:[#allocation8 + $0x68] sm:$0xff]  ;;  %v382_v54 = vld [vmem:[%s843_s2] ss:$0 sm:$0xff]  ;;  %v275_v59 = vld [vmem:[#allocation8 + $0x70] sm:$0xff] }
  0x56   :  { %520 = vmatpush3.bf16.msra.mxu1 %v519_v17  ;;  %539 = vmatprep.subr.bf16.mxu0 %v698_v0  ;;  %v555_v53 = vpack.c.bf16 %v274_v52, %v273_v51  ;;  %v276_v60 = vld [vmem:[#allocation8 + $0x78] sm:$0xff] }
  0x57   :  { %521 = vmatprep.subr.bf16.mxu1 %v698_v0  ;;  %v558_v61 = vpack.c.bf16 %v276_v60, %v275_v59  ;;  %v384_v62 = vld [vmem:[%s845_s4] ss:$0 sm:$0xff]  ;;  %s701_s4 = smov [#allocation10]  }
  0x58   :  { %v385_v3 = vld [vmem:[%s847_s6] ss:$0 sm:$0xff]  ;;  %s371_s28 = sshll.u32 %s701_s4, 4  ;;  %s372_s28 = int_to_ptr.vmem [resolvable:$true] %s371_s28 }
  0x59   :  { %541 = vmatpush3.bf16.msra.mxu0 %v540_v38  ;;  %s662_s6 = scalar_lea.vmem %s372_s28, 128  ;;  %p667_p5 = scmp.lt.s32.totalorder %s372_s28, %s372_s28 }
  0x5a   :  { %523 = vmatpush3.bf16.msra.mxu1 %v522_v20  ;;  %542 = vmatprep.subr.bf16.mxu0 %v698_v0  ;;  %p663_p4 = scmp.ne.s32.totalorder %s372_s28, %s662_s6  ;;  %p668_p6 = scmp.lt.s32.totalorder %s662_s6, %s662_s6 }
  0x5b   :  { %524 = vmatprep.subr.bf16.mxu1 %v698_v0 }
  0x5c   :  { %p669_p7 = por %p668_p6, %p667_p5 }
  0x5d   :  { %544 = vmatpush3.bf16.msra.mxu0 %v543_v41 }
  0x5e   :  { %526 = vmatpush3.bf16.msra.mxu1 %v525_v23  ;;  %545 = vmatprep.subr.bf16.mxu0 %v698_v0  ;;  %p670_p8 = pnand %p669_p7, %p663_p4 }
  0x5f   :  { %527 = vmatprep.subr.bf16.mxu1 %v698_v0 }
  0x61   :  { %547 = vmatpush3.bf16.msra.mxu0 %v546_v44 }
  0x62   :  { %529 = vmatpush3.bf16.msra.mxu1 %v528_v26  ;;  %548 = vmatprep.subr.bf16.mxu0 %v698_v0 }
  0x63   :  { %530 = vmatprep.subr.bf16.mxu1 %v698_v0 }
  0x65   :  { %550 = vmatpush3.bf16.msra.mxu0 %v549_v47 }
  0x66   :  { %532 = vmatpush3.bf16.msra.mxu1 %v531_v29  ;;  %551 = vmatprep.subr.bf16.mxu0 %v698_v0 }
  0x67   :  { %533 = vmatprep.subr.bf16.mxu1 %v698_v0 }
  0x69   :  { %553 = vmatpush3.bf16.msra.mxu0 %v552_v50 }
  0x6a   :  { %535 = vmatpush3.bf16.msra.mxu1 %v534_v32  ;;  %554 = vmatprep.subr.bf16.mxu0 %v698_v0 }
  0x6d   :  { %556 = vmatpush3.bf16.msra.mxu0 %v555_v53 }
  0x6e   :  { %557 = vmatprep.subr.bf16.mxu0 %v698_v0 }
  0x71   :  { %559 = vmatpush3.bf16.msra.mxu0 %v558_v61 }
 0x127   :  { %v162_v55 = vpop.f32.mrb[0].mxu0 }
 0x128   :  { %v163_v56 = vadd.f32 %v382_v54, %v162_v55  ;;  %v435_v57 = vpop.f32.mrb[1].mxu0 }
 0x12a   :  { %v166_v58 = vmax.f32 %v163_v56, 0.0 }
 0x12c   :  { %469 = vmatmul.mubr.f32.vlgmr.msra.gmra.mrb[0].mxu1 %v166_v58 }
 0x1ff   :  { %v256_v63 = vpop.f32.mrb[0].mxu1 }
 0x200   :  { %v257_v1 = vadd.f32 %v384_v62, %v256_v63  ;;  %v470_v0 = vpop.f32.mrb[1].mxu1 }
 0x202   :  { %v260_v2 = vmax.f32 %v257_v1, 0.0 }
 0x204   :  { %504 = vmatmul.mubr.f32.vlgmr.msra.gmra.mrb[2].mxu0 %v260_v2 }
 0x2d7   :  { %v350_v4 = vpop.f32.mrb[2].mxu0 }
 0x2d8   :  { %v351_v5 = vadd.f32 %v385_v3, %v350_v4  ;;  %v505_v6 = vpop.f32.mrb[3].mxu0 }
 0x2da   :  { %354 = vmax.xlane.f32.xlu0 %v351_v5 }
 0x367   :  { %v355_v7 = vpop.xlane.xlu0 %354 }
 0x368   :  { %v356_v8 = vsub.f32 %v351_v5, %v355_v7 }
 0x36a   :  { %v357_v9 = vmul.f32 1.442695, %v356_v8 }
 0x36c   :  { %570 = vpow2.f32 %v357_v9 }
 0x376   :  { %v571_v10 = vpop.eup %570 }
 0x377   :  { %359 = vadd.xlane.f32.xlu0 %v571_v10 }
 0x404   :  { %v360_v11 = vpop.xlane.xlu0 %359 }
 0x405   :  { %572 = vlog2.f32 %v360_v11 }
 0x40f   :  { %v573_v12 = vpop.eup %572 }
 0x410   :  { %v362_v13 = vmul.f32 0.6931472, %v573_v12 }
 0x412   :  { %v363_v14 = vsub.f32 %v356_v8, %v362_v13 }
 0x414   :  { %364 = vst [vmem:[#allocation10] sm:$0xff] %v363_v14 }
 0x415   :  { %673 = shalt.err (!%p670_p8)
}
 0x416   :  { %s674_s8 = scalar_lea.hbm %s848_s7, 128 }
 0x417   :  { %p675_p9 = scmp.ne.s32.totalorder %s848_s7, %s674_s8  ;;  %p678_p10 = scmp.lt.u32.totalorder %s674_s8, %s848_s7 }
 0x419   :  { %p680_p11 = pnand %p678_p10, %p675_p9 }
 0x41b   :  { %683 = shalt.err (!%p680_p11)
}
 0x41c   :  { %374 = dma.vmem_to_hbm [thread:$0]  %s372_s28, 128, %s848_s7, [#allocation4]  }
 0x41d   :  { %690 = dma.done.wait [#allocation4], 128  }
 0x41e   :  { %691 = vsyncadd [#allocation4], 4294967168 }
 0x41f   :  { %378 = vsyncpa [#allocation3], 1 }
 0x420   :  { %379 = vsyncpa [#allocation6], 1 }
 0x421   :  { %380 = vsyncpa [#allocation9], 1 }
 0x422   :  { %381 = vsyncpa [#allocation4], 1 }

</bundles_post_ra>
